<compile_context>
chip_gen: v7x
topology: tpu7x:2x2x1
jax: 0.10.0
libtpu: 0.0.40
codegen_flags: <defaults>
</compile_context>

<pallas_src>
import functools

import jax
import jax.numpy as jnp
from jax.experimental import pallas as pl
from jax.experimental.pallas import tpu as pltpu

LANES = 128
EPSILON = 1e-5


# ------------------------------- Pallas kernel -------------------------------
def _esr_kernel(out_ref, tgt_ref, loss_ref, err_acc, en_acc, *, n_elems):
    i = pl.program_id(0)

    @pl.when(i == 0)
    def _init():
        err_acc[...] = jnp.zeros_like(err_acc)
        en_acc[...] = jnp.zeros_like(en_acc)

    o = out_ref[...]                      # (tile_r, 128) f32
    t = tgt_ref[...]                      # (tile_r, 128) f32
    d = t - o
    # Pure elementwise VPU accumulation; cross-lane reduce deferred to the end.
    err_acc[...] += d * d                 # running sum of squared error
    en_acc[...] += t * t                  # running signal energy

    @pl.when(i == pl.num_programs(0) - 1)
    def _finalize():
        inv_n = jnp.float32(1.0 / n_elems)
        # Staged reduce: sublanes first, then lanes -> (1, 1).
        err = jnp.sum(jnp.sum(err_acc[...], axis=0, keepdims=True),
                      axis=1, keepdims=True) * inv_n
        energy = jnp.sum(jnp.sum(en_acc[...], axis=0, keepdims=True),
                         axis=1, keepdims=True) * inv_n + jnp.float32(EPSILON)
        loss_ref[...] = err / energy


# --------------------------------- wrapper -----------------------------------
def esr_loss(output, target):
    """Pallas TPU implementation of ESRLoss.forward(output, target) -> scalar."""
    assert output.shape == target.shape, (output.shape, target.shape)
    out_f = output.reshape(-1).astype(jnp.float32)
    tgt_f = target.reshape(-1).astype(jnp.float32)
    n = out_f.shape[0]

    # Lane-dense layout: flatten, pad with zeros to (padded_rows, 128).
    rows = pl.cdiv(n, LANES)
    # Big inputs: 512-row tiles (256 KiB / input tile, ~85% of HBM roofline).
    # Small inputs: 8-row tiles (one sublane group) so the grid still exercises
    # the resident-accumulator reduction path.
    tile_r = 512 if rows >= 1024 else 8
    padded_rows = pl.cdiv(rows, tile_r) * tile_r
    pad = padded_rows * LANES - n
    out2d = jnp.pad(out_f, (0, pad)).reshape(padded_rows, LANES)
    tgt2d = jnp.pad(tgt_f, (0, pad)).reshape(padded_rows, LANES)

    grid_steps = padded_rows // tile_r
    loss = pl.pallas_call(
        functools.partial(_esr_kernel, n_elems=n),
        out_shape=jax.ShapeDtypeStruct((1, 1), jnp.float32),
        grid=(grid_steps,),
        in_specs=[
            pl.BlockSpec((tile_r, LANES), lambda i: (i, 0)),
            pl.BlockSpec((tile_r, LANES), lambda i: (i, 0)),
        ],
        out_specs=pl.BlockSpec((1, 1), lambda i: (0, 0)),
        scratch_shapes=[
            pltpu.VMEM((tile_r, LANES), jnp.float32),   # squared-error accum
            pltpu.VMEM((tile_r, LANES), jnp.float32),   # signal-energy accum
        ],
        compiler_params=pltpu.CompilerParams(
            dimension_semantics=("arbitrary",)),        # reduction carry
    )(out2d, tgt2d)
    return loss[0, 0]


# ------------------------------- pure-JAX ref ---------------------------------
def esr_loss_ref(output, target):
    o = output.astype(jnp.float32)
    t = target.astype(jnp.float32)
    err = jnp.mean(jnp.square(t - o))
    energy = jnp.mean(jnp.square(t)) + EPSILON
    return err / energy


# ------------------------------------ main ------------------------------------
if __name__ == "__main__":
    key = jax.random.PRNGKey(0)
    k1, k2, k3, k4 = jax.random.split(key, 4)

    # Small shapes consistent with a (batch, channels, H, W) audio/feature map.
    output = jax.random.normal(k1, (2, 4, 16, 16), jnp.float32)
    target = jax.random.normal(k2, (2, 4, 16, 16), jnp.float32)

    loss = jax.block_until_ready(esr_loss(output, target))
    ref = esr_loss_ref(output, target)
    assert loss.shape == (), loss.shape
    assert jnp.allclose(loss, ref, rtol=1e-5, atol=1e-6), (loss, ref)

    # Second check: ragged size that exercises the zero-padding path.
    out_b = jax.random.normal(k3, (3, 5, 7), jnp.float32)
    tgt_b = 0.5 * out_b + 0.1 * jax.random.normal(k4, (3, 5, 7), jnp.float32)
    loss_b = jax.block_until_ready(esr_loss(out_b, tgt_b))
    ref_b = esr_loss_ref(out_b, tgt_b)
    assert jnp.allclose(loss_b, ref_b, rtol=1e-5, atol=1e-6), (loss_b, ref_b)

    print("KERNEL_OK")
</pallas_src>

<mosaic_0001>
module attributes {stable_mosaic.version = 11 : i64} {
  func.func @_esr_kernel(%arg0: i32, %arg1: memref<8x128xf32, #tpu.memory_space<vmem>>, %arg2: memref<8x128xf32, #tpu.memory_space<vmem>>, %arg3: memref<1x1xf32, #tpu.memory_space<vmem>>, %arg4: memref<8x128xf32, #tpu.memory_space<vmem>>, %arg5: memref<8x128xf32, #tpu.memory_space<vmem>>) attributes {dimension_semantics = [#tpu.dimension_semantics<arbitrary>], iteration_bounds = array<i64: 2>, scalar_prefetch = 0 : i64, scratch_operands = 2 : i64, tpu.core_type = #tpu.core_type<tc>, window_params = [{transform_indices = @transform_0, window_bounds = array<i64: 8, 128>}, {transform_indices = @transform_1, window_bounds = array<i64: 8, 128>}, {pipeline_mode = #tpu.pipeline_mode<synchronous>, transform_indices = @transform_2, window_bounds = array<i64: 1, 1>}]} {
    %c0_i32 = arith.constant 0 : i32
    %0 = arith.cmpi eq, %arg0, %c0_i32 : i32
    %1 = arith.extui %0 : i1 to i32
    %c0_i32_0 = arith.constant 0 : i32
    %2 = arith.cmpi ne, %1, %c0_i32_0 : i32
    scf.if %2 {
      %cst = arith.constant 0.000000e+00 : f32
      %17 = vector.broadcast %cst : f32 to vector<8x128xf32>
      %c0_13 = arith.constant 0 : index
      %c0_14 = arith.constant 0 : index
      %18 = vector.load %arg4[%c0_13, %c0_14] : memref<8x128xf32, #tpu.memory_space<vmem>>, vector<8x128xf32>
      tpu.vector_store %arg4[%c0_13, %c0_14], %17 {strides = array<i32>} : memref<8x128xf32, #tpu.memory_space<vmem>>, vector<8x128xf32>,
      %cst_15 = arith.constant 0.000000e+00 : f32
      %19 = vector.broadcast %cst_15 : f32 to vector<8x128xf32>
      %c0_16 = arith.constant 0 : index
      %c0_17 = arith.constant 0 : index
      %20 = vector.load %arg5[%c0_16, %c0_17] : memref<8x128xf32, #tpu.memory_space<vmem>>, vector<8x128xf32>
      tpu.vector_store %arg5[%c0_16, %c0_17], %19 {strides = array<i32>} : memref<8x128xf32, #tpu.memory_space<vmem>>, vector<8x128xf32>,
    } else {
    }
    %c0 = arith.constant 0 : index
    %c0_1 = arith.constant 0 : index
    %3 = vector.load %arg1[%c0, %c0_1] : memref<8x128xf32, #tpu.memory_space<vmem>>, vector<8x128xf32>
    %c0_2 = arith.constant 0 : index
    %c0_3 = arith.constant 0 : index
    %4 = vector.load %arg2[%c0_2, %c0_3] : memref<8x128xf32, #tpu.memory_space<vmem>>, vector<8x128xf32>
    %5 = arith.subf %4, %3 : vector<8x128xf32>
    %c0_4 = arith.constant 0 : index
    %c0_5 = arith.constant 0 : index
    %6 = vector.load %arg4[%c0_4, %c0_5] : memref<8x128xf32, #tpu.memory_space<vmem>>, vector<8x128xf32>
    %7 = arith.mulf %5, %5 : vector<8x128xf32>
    %8 = arith.addf %6, %7 : vector<8x128xf32>
    %c0_6 = arith.constant 0 : index
    %c0_7 = arith.constant 0 : index
    %9 = vector.load %arg4[%c0_6, %c0_7] : memref<8x128xf32, #tpu.memory_space<vmem>>, vector<8x128xf32>
    tpu.vector_store %arg4[%c0_6, %c0_7], %8 {strides = array<i32>} : memref<8x128xf32, #tpu.memory_space<vmem>>, vector<8x128xf32>,
    %c0_8 = arith.constant 0 : index
    %c0_9 = arith.constant 0 : index
    %10 = vector.load %arg5[%c0_8, %c0_9] : memref<8x128xf32, #tpu.memory_space<vmem>>, vector<8x128xf32>
    %11 = arith.mulf %4, %4 : vector<8x128xf32>
    %12 = arith.addf %10, %11 : vector<8x128xf32>
    %c0_10 = arith.constant 0 : index
    %c0_11 = arith.constant 0 : index
    %13 = vector.load %arg5[%c0_10, %c0_11] : memref<8x128xf32, #tpu.memory_space<vmem>>, vector<8x128xf32>
    tpu.vector_store %arg5[%c0_10, %c0_11], %12 {strides = array<i32>} : memref<8x128xf32, #tpu.memory_space<vmem>>, vector<8x128xf32>,
    %c1_i32 = arith.constant 1 : i32
    %14 = arith.cmpi eq, %arg0, %c1_i32 : i32
    %15 = arith.extui %14 : i1 to i32
    %c0_i32_12 = arith.constant 0 : i32
    %16 = arith.cmpi ne, %15, %c0_i32_12 : i32
    scf.if %16 {
      %c0_13 = arith.constant 0 : index
      %c0_14 = arith.constant 0 : index
      %17 = vector.load %arg4[%c0_13, %c0_14] : memref<8x128xf32, #tpu.memory_space<vmem>>, vector<8x128xf32>
      %cst = arith.constant dense<0.000000e+00> : vector<128xf32>
      %18 = vector.multi_reduction <add>, %17, %cst [0] : vector<8x128xf32> to vector<128xf32>
      %19 = vector.shape_cast %18 : vector<128xf32> to vector<1x128xf32>
      %cst_15 = arith.constant dense<0.000000e+00> : vector<1xf32>
      %20 = vector.multi_reduction <add>, %19, %cst_15 [1] : vector<1x128xf32> to vector<1xf32>
      %21 = vector.shape_cast %20 : vector<1xf32> to vector<1x1xf32>
      %cst_16 = arith.constant 4.8828125E-4 : f32
      %22 = vector.broadcast %cst_16 : f32 to vector<1x1xf32>
      %23 = arith.mulf %21, %22 : vector<1x1xf32>
      %c0_17 = arith.constant 0 : index
      %c0_18 = arith.constant 0 : index
      %24 = vector.load %arg5[%c0_17, %c0_18] : memref<8x128xf32, #tpu.memory_space<vmem>>, vector<8x128xf32>
      %cst_19 = arith.constant dense<0.000000e+00> : vector<128xf32>
      %25 = vector.multi_reduction <add>, %24, %cst_19 [0] : vector<8x128xf32> to vector<128xf32>
      %26 = vector.shape_cast %25 : vector<128xf32> to vector<1x128xf32>
      %cst_20 = arith.constant dense<0.000000e+00> : vector<1xf32>
      %27 = vector.multi_reduction <add>, %26, %cst_20 [1] : vector<1x128xf32> to vector<1xf32>
      %28 = vector.shape_cast %27 : vector<1xf32> to vector<1x1xf32>
      %cst_21 = arith.constant 4.8828125E-4 : f32
      %29 = vector.broadcast %cst_21 : f32 to vector<1x1xf32>
      %30 = arith.mulf %28, %29 : vector<1x1xf32>
      %cst_22 = arith.constant 9.99999974E-6 : f32
      %31 = vector.broadcast %cst_22 : f32 to vector<1x1xf32>
      %32 = arith.addf %30, %31 : vector<1x1xf32>
      %33 = arith.divf %23, %32 : vector<1x1xf32>
      %c0_23 = arith.constant 0 : index
      %c0_24 = arith.constant 0 : index
      %34 = vector.load %arg3[%c0_23, %c0_24] : memref<1x1xf32, #tpu.memory_space<vmem>>, vector<1x1xf32>
      tpu.vector_store %arg3[%c0_23, %c0_24], %33 {strides = array<i32>} : memref<1x1xf32, #tpu.memory_space<vmem>>, vector<1x1xf32>,
    } else {
    }
    return
  }
  func.func @transform_0(%arg0: i32) -> (i32, i32) {
    %c0_i32 = arith.constant 0 : i32
    %c0_i32_0 = arith.constant 0 : i32
    return %arg0, %c0_i32 : i32, i32
  }
  func.func @transform_1(%arg0: i32) -> (i32, i32) {
    %c0_i32 = arith.constant 0 : i32
    %c0_i32_0 = arith.constant 0 : i32
    return %arg0, %c0_i32 : i32, i32
  }
  func.func @transform_2(%arg0: i32) -> (i32, i32) {
    %c0_i32 = arith.constant 0 : i32
    %c0_i32_0 = arith.constant 0 : i32
    %c0_i32_1 = arith.constant 0 : i32
    return %c0_i32, %c0_i32_0 : i32, i32
  }
}

</mosaic_0001>

<bundles_post_ra>
// kernel: tpu_custom_call.1
= control target key start
LH: loop header
LB: loop body
LE: loop exit
PB: predicated region body
PF: predicated region fallthrough
CT: control target
= control target key end

     0   :  { %7 = vsyncpa [#allocation5], 0  ;;  %s703_s0 = inlined_call_operand.hbm [shape: f32[16,128], index: 0, kind: input, shape index: {}]   ;;  %s704_s1 = inlined_call_operand.hbm [shape: f32[16,128], index: 1, kind: input, shape index: {}]   ;;  %s705_s2 = inlined_call_operand.hbm [shape: f32[1,1], index: 2, kind: output, shape index: {}]  }
   0x1   :  { %9 = vsyncpa [#allocation5 + $0x1], 0 }
   0x2   :  { %10 = vsyncpa [#allocation8], 0 }
   0x3   :  { %12 = vsyncpa [#allocation8 + $0x1], 0 }
   0x4   :  { %13 = vsyncpa [#allocation6], 0  ;;  %s529_s9 = smov 0   ;;  %s531_s10 = smov 0  }
   0x5   :  { %s533_s11 = smov 0   ;;  %s535_s12 = smov 0  }
   0x6 LB: > { %s548_s13 = sadd.s32 4294967295, %s508_s12   ;;  %s551_s14 = sadd.s32 1, %s508_s12   ;;  %s508_s12 = sphi %s535_s12, %s717_s12   ;;  %s504_s11 = sphi %s533_s11, %s716_s11   ;;  %s500_s10 = sphi %s531_s10, %s715_s10   ;;  %s496_s9 = sphi %s529_s9, %s714_s9  }
   0x7   : > { %s23_s15 = ssub.s32 %s508_s12, %s551_s14  ;;  %s26_s16 = sadd.s32 1, %s504_s11 }
   0x8   : > { %p24_p0 = scmp.eq.s32.totalorder %s23_s15, 0  ;;  %p33_p1 = scmp.ne.s32.totalorder %s504_s11, %s500_s10 }
   0x9   : > { %p34_p2 = scmp.eq.s32.totalorder %s508_s12, 0  ;;  %p39_p3 = scmp.ne.s32.totalorder %s500_s10, %s496_s9 }
   0xa   : > { %s561_s17 = scalar_select %p24_p0, %s504_s11, %s26_s16  }
   0xb   : > { %p35_p4 = por %p34_p2, %p33_p1  ;;  %p40_p5 = scmp.eq.s32.totalorder %s548_s13, 0 }
   0xc   : > { %p341_p6 = scmp.lt.s32.totalorder %s508_s12, 2  ;;  %s570_s19 = sand.u32 1, %s504_s11  }
   0xd   : > { %p565_p7 = por %p40_p5, %p39_p3  ;;  %s313_s20 = sshll.u32 %s570_s19, 3 }
   0xe   : > { %s314_s21 = sshll.u32 %s508_s12, 7  ;;  %s114_s25 = scalar_lea.vmem [#allocation4], %s313_s20 }
   0xf   : > { %s707_s18 = scalar_select %p565_p7, 1, 0 }
  0x10   : > { %s579_s24 = scalar_lea.hbm %s703_s0, %s314_s21  ;;  %s121_s26 = sshll.u32 %s114_s25, 4  ;;  %s583_s26 = int_to_ptr.vmem [resolvable:$true] %s121_s26 }
  0x11   : > { %p585_p8 = pnand %p341_p6, %p35_p4  ;;  %s111_s28 = scalar_lea.sflag [#allocation5], %s570_s19 }
  0x12   : > { %s380_s29 = scalar_lea.hbm %s579_s24, 128  ;;  %s385_s4 = scalar_lea.hbm %s703_s0, 256 }
  0x13   : > { %p381_p11 = scmp.ne.s32.totalorder %s579_s24, %s380_s29  ;;  %p382_p12 = pneg %p585_p8 }
  0x14   : > { %p386_p1 = scmp.lt.u32.totalorder %s579_s24, %s703_s0  ;;  %p387_p2 = scmp.lt.u32.totalorder %s385_s4, %s380_s29 }
  0x15   : > { %p383_p13 = pnand %p382_p12, %p381_p11  ;;  %p389_p4 = scmp.lt.u32.totalorder %s380_s29, %s579_s24 }
  0x16   : > { %p388_p3 = por %p387_p2, %p386_p1 }
  0x17   : > { %p384_p0 = pneg %p383_p13 }
  0x18   : > { %p390_p5 = por %p389_p4, %p388_p3 }
  0x1a   : > { %p391_p6 = pnand %p390_p5, %p384_p0 }
  0x1c   : > { %394 = shalt.err (!%p391_p6)
}
  0x1d   : > { %s395_s7 = scalar_lea.vmem %s583_s26, 128  ;;  %s510_s8 = smov [#allocation4]  }
  0x1e   : > { %p396_p11 = scmp.ne.s32.totalorder %s583_s26, %s395_s7  ;;  %s400_s9 = sshll.u32 %s510_s8, 4  ;;  %s401_s9 = int_to_ptr.vmem [resolvable:$false] %s400_s9 }
  0x1f   : > { %s402_s15 = scalar_lea.vmem %s401_s9, 256  ;;  %p403_p10 = scmp.lt.s32.totalorder %s583_s26, %s401_s9 }
  0x20   : > { %p398_p13 = pnand %p396_p11, %p382_p12  ;;  %p404_p1 = scmp.lt.s32.totalorder %s402_s15, %s395_s7 }
  0x22   : > { %p399_p9 = pneg %p398_p13  ;;  %p405_p2 = por %p404_p1, %p403_p10 }
  0x24   : > { %p406_p3 = pnand %p405_p2, %p399_p9 }
  0x26   : > { %409 = shalt.err (!%p406_p3)
}
  0x27   : > { %337 = dma.hbm_to_vmem [thread:$0]  (!%p585_p8), %s579_s24, 128, %s583_s26, %s111_s28  }
  0x28   : > { %p709_p0 = scmp.lt.s32.totalorder %s508_s12, 3  ;;  %p710_p4 = scmp.ge.s32.totalorder %s508_s12, 1 }
  0x29   : > { %s630_s25 = scalar_lea.hbm %s704_s1, %s314_s21  ;;  %s132_s29 = scalar_lea.vmem [#allocation7], %s313_s20 }
  0x2a   : > { %p621_p5 = pnand %p710_p4, %p709_p0  ;;  %s139_s30 = sshll.u32 %s132_s29, 4  ;;  %s140_s30 = int_to_ptr.vmem [resolvable:$true] %s139_s30 }
  0x2b   : > { %s129_s24 = scalar_lea.sflag [#allocation8], %s570_s19  ;;  %s410_s26 = scalar_lea.hbm %s630_s25, 128 }
  0x2c   : > { %s711_s16 = scalar_select %p621_p5, 1, 0 }
  0x2d   : > { %p411_p9 = scmp.ne.s32.totalorder %s630_s25, %s410_s26  ;;  %s415_s21 = scalar_lea.hbm %s704_s1, 256 }
  0x2e   : > { %p416_p11 = scmp.lt.u32.totalorder %s630_s25, %s704_s1  ;;  %p417_p13 = scmp.lt.u32.totalorder %s415_s21, %s410_s26 }
  0x2f   : > { %p413_p10 = pnand %p411_p9, %p382_p12  ;;  %p419_p2 = scmp.lt.u32.totalorder %s410_s26, %s630_s25 }
  0x30   : > { %p418_p1 = por %p417_p13, %p416_p11 }
  0x31   : > { %p414_p6 = pneg %p413_p10 }
  0x32   : > { %p420_p3 = por %p419_p2, %p418_p1 }
  0x34   : > { %p421_p0 = pnand %p420_p3, %p414_p6 }
  0x36   : > { %424 = shalt.err (!%p421_p0)
}
  0x37   : > { %s425_s19 = scalar_lea.vmem %s140_s30, 128  ;;  %s511_s20 = smov [#allocation7]  }
  0x38   : > { %p426_p4 = scmp.ne.s32.totalorder %s140_s30, %s425_s19  ;;  %s430_s5 = sshll.u32 %s511_s20, 4  ;;  %s431_s5 = int_to_ptr.vmem [resolvable:$false] %s430_s5 }
  0x39   : > { %s432_s6 = scalar_lea.vmem %s431_s5, 256  ;;  %p433_p7 = scmp.lt.s32.totalorder %s140_s30, %s431_s5 }
  0x3a   : > { %p428_p9 = pnand %p426_p4, %p382_p12  ;;  %p434_p5 = scmp.lt.s32.totalorder %s432_s6, %s425_s19 }
  0x3c   : > { %p429_p10 = pneg %p428_p9  ;;  %p435_p11 = por %p434_p5, %p433_p7 }
  0x3e   : > { %p436_p13 = pnand %p435_p11, %p429_p10 }
  0x40   : > { %439 = shalt.err (!%p436_p13)
}
  0x41   : > { %340 = dma.hbm_to_vmem [thread:$0]  (!%p585_p8), %s630_s25, 128, %s140_s30, %s129_s24  }
  0x42   : > { %p712_p6 = scmp.ne.s32.totalorder %s711_s16, 0 }
  0x43   : > { %s150_s7 = sand.u32 (!%p712_p6), 1, %s500_s10   ;;  %p713_p12 = scmp.ne.s32.totalorder (!%p712_p6), %s707_s18, 0 }
  0x44   : > { %148 = sbr.rel (%p712_p6) target bundleno = 297 (0x129), region = 28  ;;  %s318_s8 = sshll.u32 (!%p712_p6), %s150_s7, 3 }
  0x45   : > { %s151_s9 = scalar_lea.sflag (!%p712_p6), [#allocation5], %s150_s7  ;;  %s154_s15 = scalar_lea.vmem (!%p712_p6), [#allocation4], %s318_s8 }
  0x4b   : > { %483 = dma.done.wait (%p713_p12), %s151_s9, 128  }
  0x4c   : > { %485 = vsyncadd (%p713_p12), %s151_s9, 4294967168  ;;  %s160_s22 = scalar_lea.sflag [#allocation8], %s150_s7  ;;  %s163_s23 = scalar_lea.vmem [#allocation7], %s318_s8 }
  0x4d   : > { %487 = dma.done.wait (%p713_p12), %s160_s22, 128  }
  0x4e   : > { %489 = vsyncadd (%p713_p12), %s160_s22, 4294967168  ;;  %p320_p7 = scmp.ne.s32.totalorder %s548_s13, 0 }
  0x4f   : > { %v512_v0 = vmov (!%p320_p7), 0.0  }
  0x50   : > { %187 = sbr.rel (%p320_p7) target bundleno = 87 (0x57), region = 40  ;;  %188 = vst [vmem:[#allocation2] sm:$0xff] (!%p320_p7), %v512_v0  ;;  %189 = vst [vmem:[#allocation3] sm:$0xff] (!%p320_p7), %v512_v0 }
  0x57 PF: > { %v190_v1 = vld [vmem:[%s154_s15] sm:$0xff]  ;;  %v191_v2 = vld [vmem:[%s163_s23] sm:$0xff]  ;;  %p321_p8 = scmp.ne.s32.totalorder %s548_s13, 1 }
  0x58   : > { %v192_v3 = vsub.f32 %v191_v2, %v190_v1  ;;  %v197_v4 = vld [vmem:[#allocation3] sm:$0xff]  ;;  %v198_v5 = vmul.f32 %v191_v2, %v191_v2  ;;  %v193_v6 = vld [vmem:[#allocation2] sm:$0xff]  ;;  %vm228_vm0 = vcmask (!%p321_p8), 0  }
  0x59   : > { %204 = sbr.rel (%p321_p8) target bundleno = 272 (0x110), region = 44 }
  0x5a   : > { %v194_v7 = vmul.f32 %v192_v3, %v192_v3  ;;  %v199_v8 = vadd.f32 %v198_v5, %v197_v4 }
  0x5c   : > { %v195_v9 = vadd.f32 %v194_v7, %v193_v6  ;;  %200 = vst [vmem:[#allocation3] sm:$0xff] %v199_v8 }
  0x5e   : > { %196 = vst [vmem:[#allocation2] sm:$0xff] %v195_v9 }
  0x63   : > { %v215_v10 = vld [vmem:[#allocation3] sm:$0xff] }
  0x64   : > { %v216_v12 = vrot.slane %v215_v10, 4 }
  0x65   : > { %v205_v11 = vld [vmem:[#allocation2] sm:$0xff] }
  0x66   : > { %v206_v13 = vrot.slane %v205_v11, 4  ;;  %v217_v14 = vadd.f32 %v216_v12, %v215_v10 }
  0x68   : > { %v207_v15 = vadd.f32 %v206_v13, %v205_v11  ;;  %v218_v16 = vrot.slane %v217_v14, 2 }
  0x6a   : > { %v208_v17 = vrot.slane %v207_v15, 2  ;;  %v219_v18 = vadd.f32 %v218_v16, %v217_v14 }
  0x6c   : > { %v209_v19 = vadd.f32 %v208_v17, %v207_v15  ;;  %v220_v20 = vrot.slane %v219_v18, 1 }
  0x6e   : > { %v210_v21 = vrot.slane %v209_v19, 1  ;;  %v221_v22 = vadd.f32 %v220_v20, %v219_v18 }
  0x70   : > { %222 = vadd.xlane.f32.xlu0 %v221_v22  ;;  %v211_v23 = vadd.f32 %v210_v21, %v209_v19 }
  0x74   : > { %212 = vadd.xlane.f32.xlu0 %v211_v23 }
  0xfd   : > { %v223_v24 = vpop.xlane.xlu0 %222 }
  0xfe   : > { %v224_v25 = vmul.f32 0.00048828125, %v223_v24 }
 0x100   : > { %v225_v26 = vadd.f32 1e-05, %v224_v25 }
 0x101   : > { %v213_v27 = vpop.xlane.xlu0 %212 }
 0x102   : > { %378 = vrcp.f32 %v225_v26  ;;  %v214_v28 = vmul.f32 0.00048828125, %v213_v27 }
 0x10c   : > { %v379_v29 = vpop.eup %378 }
 0x10d   : > { %v227_v30 = vmul.f32 %v379_v29, %v214_v28 }
 0x10f   : > { %229 = vst.msk [vmem:[#allocation9] sm:$0x1] %vm228_vm0, %v227_v30 }
 0x110 PF: > { %p342_p5 = scmp.eq.s32.totalorder %s548_s13, 1  ;;  %s513_s18 = smov [#allocation9]  }
 0x111   : > { %s237_s27 = sshll.u32 %s513_s18, 4  ;;  %s238_s27 = int_to_ptr.vmem [resolvable:$true] %s237_s27 }
 0x112   : > { %s440_s16 = scalar_lea.vmem %s238_s27, 16  ;;  %s446_s25 = scalar_lea.vmem %s238_s27, 32 }
 0x113   : > { %p441_p1 = scmp.ne.s32.totalorder %s238_s27, %s440_s16  ;;  %p447_p0 = scmp.lt.s32.totalorder %s238_s27, %s238_s27 }
 0x114   : > { %p448_p4 = scmp.lt.s32.totalorder %s446_s25, %s440_s16 }
 0x115   : > { %p442_p2 = pnand %p441_p1, %p342_p5 }
 0x116   : > { %p449_p9 = por %p448_p4, %p447_p0 }
 0x117   : > { %p443_p3 = pneg %p442_p2 }
 0x119   : > { %p450_p10 = pnand %p449_p9, %p443_p3 }
 0x11b   : > { %453 = shalt.err (!%p450_p10)
}
 0x11c   : > { %s454_s24 = scalar_lea.hbm %s705_s2, 16 }
 0x11d   : > { %p455_p11 = scmp.ne.s32.totalorder %s705_s2, %s454_s24  ;;  %p460_p12 = scmp.lt.u32.totalorder %s454_s24, %s705_s2 }
 0x11f   : > { %p456_p13 = pnand %p455_p11, %p342_p5 }
 0x121   : > { %p457_p6 = pneg %p456_p13 }
 0x123   : > { %p462_p7 = pnand %p460_p12, %p457_p6 }
 0x125   : > { %465 = shalt.err (!%p462_p7)
}
 0x126   : > { %331 = dma.vmem_to_hbm [thread:$0]  (%p342_p5), %s238_s27, 16, %s705_s2, [#allocation6]  }
 0x127   : > { %491 = dma.done.wait (%p342_p5), [#allocation6], 16  }
 0x128   : > { %493 = vsyncadd (%p342_p5), [#allocation6], 4294967280 }
 0x129 PF: > { %p16_p8 = scmp.ge.s32.totalorder %s551_s14, 4   ;;  %s714_s9 = smov %s500_s10 }
 0x12a   : > { %s715_s10 = smov %s504_s11  ;;  %s716_s11 = smov %s561_s17 }
 0x12b   : > { %s717_s12 = smov %s551_s14  ;;  %18 = sbr.rel (!%p16_p8) target bundleno = 6 (0x6), region = 86 }
 0x132   :  { %250 = vsyncpa [#allocation5], 1 }
 0x133   :  { %252 = vsyncpa [#allocation5 + $0x1], 1 }
 0x134   :  { %253 = vsyncpa [#allocation8], 1 }
 0x135   :  { %255 = vsyncpa [#allocation8 + $0x1], 1 }
 0x136   :  { %256 = vsyncpa [#allocation6], 1 }
 0x137   :  { %258 = vsyncpa [#allocation6 + $0x1], 1 }

</bundles_post_ra>
